<compile_context>
chip_gen: v7x
topology: tpu7x:2x2x1
jax: 0.10.0
libtpu: 0.0.40
codegen_flags: <defaults>
</compile_context>

<pallas_src>
import functools

import jax
import jax.numpy as jnp
from jax.experimental import pallas as pl
from jax.experimental.pallas import tpu as pltpu

DIM = 32
HEADS = 4
HEAD_DIM = DIM // HEADS
FFN_DIM = int(DIM * 4.0)
EPS = 1e-5                      # PyTorch nn.LayerNorm default
SCALE = HEAD_DIM ** -0.5        # qk_scale=None -> head_dim ** -0.5

_TARGET_ROWS = 2048                      # amortize ~0.35us/step pipeline overhead
_STEP_VMEM_BUDGET = 18 * 1024 * 1024     # per-step working-set gate (v7x-safe)
_VMEM_LIMIT = 48 * 1024 * 1024           # < v7x 64 MiB physical, > 16/32 MiB defaults


def _layernorm(x, w, b):
    mu = jnp.mean(x, axis=-1, keepdims=True)
    var = jnp.mean((x - mu) ** 2, axis=-1, keepdims=True)
    return (x - mu) * jax.lax.rsqrt(var + EPS) * w + b


def encoder_layer_kernel(src_ref, pos_ref,
                         ln1w_ref, ln1b_ref,
                         wqk_ref, bqk_ref, wv_ref, bv_ref,
                         wo_ref, bo_ref,
                         ln2w_ref, ln2b_ref,
                         w1_ref, b1_ref, w2_ref, b2_ref,
                         out_ref, *, seq_len, heads, head_dim):
    x = src_ref[...].astype(jnp.float32)     # (R, C) flattened rows of this block
    p = pos_ref[...].astype(jnp.float32)     # (R, C)
    R, C = x.shape
    bb = R // seq_len                         # batch elements in this row block
    mxu = wqk_ref.dtype                       # bf16 weights -> bf16 MXU operands

    # ---- pre-norm (f32 VPU math) ----
    xn = _layernorm(x, ln1w_ref[...], ln1b_ref[...])

    # ---- fused Q|K projection (with pos, scale pre-folded into Wq), V projection ----
    qk = jnp.dot((xn + p).astype(mxu), wqk_ref[...],
                 preferred_element_type=jnp.float32) + bqk_ref[...]       # (R, 2C)
    v = jnp.dot(xn.astype(mxu), wv_ref[...],
                preferred_element_type=jnp.float32) + bv_ref[...]          # (R, C)

    # ---- multi-head attention: single batched contraction over heads*bb ----
    # TODO(synk): src_mask / key_padding_mask / attn_bias (all None in this config) not implemented.
    def split_heads(t, off):
        # (R, C) -> (heads*bb, N, D), batch index = h*bb + b (head-major).
        return jnp.concatenate(
            [t[:, off + h * head_dim: off + (h + 1) * head_dim]
             .reshape(bb, seq_len, head_dim) for h in range(heads)], axis=0)

    qh = split_heads(qk, 0).astype(mxu)       # (H*bb, N, D)
    kh = split_heads(qk, C).astype(mxu)       # (H*bb, N, D)
    vh = split_heads(v, 0).astype(mxu)        # (H*bb, N, D)

    s = jnp.einsum('bnd,bmd->bnm', qh, kh,
                   preferred_element_type=jnp.float32)                     # (H*bb, N, N)
    s = s - jnp.max(s, axis=-1, keepdims=True)
    e = jnp.exp(s)
    attn = e * pl.reciprocal(jnp.sum(e, axis=-1, keepdims=True), approx=True)
    ctx = jnp.einsum('bnm,bmd->bnd', attn.astype(mxu), vh,
                     preferred_element_type=jnp.float32)                   # (H*bb, N, D)

    # Merge heads back to (R, C) (lane concat of the per-head slabs) and run ONE Wo matmul.
    ctx2 = jnp.concatenate(
        [ctx[h * bb:(h + 1) * bb].reshape(R, head_dim) for h in range(heads)], axis=-1)
    attn_out = jnp.dot(ctx2.astype(mxu), wo_ref[...],
                       preferred_element_type=jnp.float32) + bo_ref[...]   # (R, C)

    src1 = x + attn_out          # residual (LayerScale = Identity, DropPath = Identity)

    # ---- FFN: pre-norm + fc1 + gelu + fc2 + residual ----
    yn = _layernorm(src1, ln2w_ref[...], ln2b_ref[...])
    h1 = jnp.dot(yn.astype(mxu), w1_ref[...],
                 preferred_element_type=jnp.float32) + b1_ref[...]
    # TODO(synk): PyTorch nn.GELU defaults to the exact erf form; tanh approximation used for robust Mosaic lowering.
    h1 = jax.nn.gelu(h1, approximate=True)
    h2 = jnp.dot(h1.astype(mxu), w2_ref[...],
                 preferred_element_type=jnp.float32) + b2_ref[...]

    # TODO(synk): if production C is really 32, present the residual/store path as a
    # lane-dense (rows/4, 128) slab to avoid masked vst.msk partial stores.
    out_ref[...] = (src1 + h2).astype(out_ref.dtype)


def _step_vmem_bytes(bb, N, C, ffn, heads):
    """Rough per-grid-step VMEM working set in bytes (f32)."""
    rows = bb * N
    f32 = 4
    act_io = 3 * 2 * rows * C * f32              # src, pos, out (double-buffered)
    qkv = 3 * rows * C * f32
    scores = 3 * bb * heads * N * N * f32        # scores / exp / probs headroom
    ffn_buf = rows * ffn * f32
    return act_io + qkv + scores + ffn_buf + rows * C * f32


def _pick_batch_block(B, N, C, ffn, heads):
    """Batch elements per grid step: big row blocks, VMEM-gated, >=2 steps if possible."""
    total_rows = B * N

    def valid(bb):
        rows = bb * N
        if rows % 8 != 0 and rows != total_rows:         # sublane alignment
            return False
        return _step_vmem_bytes(bb, N, C, ffn, heads) <= _STEP_VMEM_BUDGET

    cands = [d for d in range(1, B + 1) if B % d == 0 and valid(d)]
    if not cands:
        return B                                          # single full-problem step
    multi = [d for d in cands if B // d >= 2] or cands    # keep both v7x TCs busy
    fit = [d for d in multi if d * N <= _TARGET_ROWS] or [min(multi)]
    even = [d for d in fit if (B // d) % 2 == 0]          # even step count preferred
    return max(even) if even else max(fit)


def transformer_encoder_layer(src, pos, params, *, batch_block=None,
                              mxu_dtype=jnp.bfloat16):
    (ln1w, ln1b, wq, bq, wk, bk, wv, bv, wo, bo,
     ln2w, ln2b, w1, b1, w2, b2) = params
    B, N, C = src.shape
    ffn = w1.shape[1]

    # Host-side one-time parameter re-packing:
    #   * fuse Q|K and fold head_dim**-0.5 into the Q half,
    #   * cast all weight matrices to bf16 for the MXU (biases / LN stay f32).
    wqk = jnp.concatenate([wq * SCALE, wk], axis=1).astype(mxu_dtype)      # (C, 2C)
    bqk = jnp.concatenate([bq * SCALE, bk], axis=1).astype(jnp.float32)    # (1, 2C)
    kparams = (ln1w, ln1b, wqk, bqk,
               wv.astype(mxu_dtype), bv, wo.astype(mxu_dtype), bo,
               ln2w, ln2b, w1.astype(mxu_dtype), b1, w2.astype(mxu_dtype), b2)

    bb = batch_block if batch_block is not None else _pick_batch_block(B, N, C, ffn, HEADS)
    assert B % bb == 0
    rows = bb * N
    grid = (B // bb,)

    # Flatten to a (B*N, C) slab; big row blocks per step.
    x2 = src.reshape(B * N, C)
    p2 = pos.reshape(B * N, C)

    act_spec = pl.BlockSpec((rows, C), lambda i: (i, 0))
    # Constant index maps -> weights fetched once and kept resident across steps.
    param_specs = [pl.BlockSpec(w.shape, lambda i, nd=w.ndim: (0,) * nd) for w in kparams]

    kernel = functools.partial(encoder_layer_kernel,
                               seq_len=N, heads=HEADS, head_dim=HEAD_DIM)

    flops = int(2 * B * N * C * (2 * C + C + C + 2 * ffn)
                + 4 * B * HEADS * N * N * HEAD_DIM)
    transcend = int(B * N * (HEADS * N + ffn))
    bytes_acc = int(4 * 3 * B * N * C
                    + sum(int(w.size) * w.dtype.itemsize for w in kparams))

    out2 = pl.pallas_call(
        kernel,
        out_shape=jax.ShapeDtypeStruct((B * N, C), src.dtype),
        grid_spec=pltpu.PrefetchScalarGridSpec(
            num_scalar_prefetch=0,
            grid=grid,
            in_specs=[act_spec, act_spec] + param_specs,
            out_specs=pl.BlockSpec((rows, C), lambda i: (i, 0)),
        ),
        compiler_params=pltpu.CompilerParams(
            dimension_semantics=("parallel",),
            vmem_limit_bytes=_VMEM_LIMIT),
        cost_estimate=pl.CostEstimate(flops=flops, transcendentals=transcend,
                                      bytes_accessed=bytes_acc),
    )(x2, p2, *kparams)
    # TODO(synk): for ViT-scale N (>=1024) replace the full (bb*H, N, N) scores with
    # flash-style key-block tiling (the VMEM gate above only forces bb down).
    return out2.reshape(B, N, C)


def reference(src, pos, params):
    (ln1w, ln1b, wq, bq, wk, bk, wv, bv, wo, bo,
     ln2w, ln2b, w1, b1, w2, b2) = params

    def ln(x, w, b):
        mu = x.mean(-1, keepdims=True)
        var = ((x - mu) ** 2).mean(-1, keepdims=True)
        return (x - mu) / jnp.sqrt(var + EPS) * w + b

    B, N, C = src.shape
    xn = ln(src, ln1w, ln1b)
    qkin = xn + pos
    q = qkin @ wq + bq
    k = qkin @ wk + bk
    v = xn @ wv + bv
    qh = q.reshape(B, N, HEADS, HEAD_DIM).transpose(0, 2, 1, 3)
    kh = k.reshape(B, N, HEADS, HEAD_DIM).transpose(0, 2, 1, 3)
    vh = v.reshape(B, N, HEADS, HEAD_DIM).transpose(0, 2, 1, 3)
    scores = (qh @ kh.transpose(0, 1, 3, 2)) * SCALE
    attn = jax.nn.softmax(scores, axis=-1)
    o = (attn @ vh).transpose(0, 2, 1, 3).reshape(B, N, C)
    o = o @ wo + bo
    s1 = src + o
    yn = ln(s1, ln2w, ln2b)
    h = jax.nn.gelu(yn @ w1 + b1, approximate=True)
    return s1 + h @ w2 + b2


if __name__ == "__main__":
    key = jax.random.PRNGKey(0)
    B, N, C = 2, 8, DIM
    ks = jax.random.split(key, 8)

    src = jax.random.normal(ks[0], (B, N, C), jnp.float32)
    pos = 0.1 * jax.random.normal(ks[1], (B, N, C), jnp.float32)

    def w(k, shape):
        return 0.02 * jax.random.normal(k, shape, jnp.float32)

    params = (
        jnp.ones((1, C), jnp.float32), jnp.zeros((1, C), jnp.float32),        # LayerNorm1
        w(ks[2], (C, C)), jnp.zeros((1, C), jnp.float32),                     # Wq, bq
        w(ks[3], (C, C)), jnp.zeros((1, C), jnp.float32),                     # Wk, bk
        w(ks[4], (C, C)), jnp.zeros((1, C), jnp.float32),                     # Wv, bv
        w(ks[5], (C, C)), jnp.zeros((1, C), jnp.float32),                     # Wo, bo
        jnp.ones((1, C), jnp.float32), jnp.zeros((1, C), jnp.float32),        # LayerNorm2 (FFN)
        w(ks[6], (C, FFN_DIM)), jnp.zeros((1, FFN_DIM), jnp.float32),         # fc1
        w(ks[7], (FFN_DIM, C)), jnp.zeros((1, C), jnp.float32),               # fc2
    )

    out = transformer_encoder_layer(src, pos, params)
    jax.block_until_ready(out)

    ref = reference(src, pos, params)   # f32 reference; kernel uses bf16 MXU operands
    err = float(jnp.max(jnp.abs(out - ref)))
    assert out.shape == (B, N, C)
    assert jnp.allclose(out, ref, atol=5e-3, rtol=5e-3), f"max abs err {err}"

    print("KERNEL_OK")
</pallas_src>

<mosaic_0001>
module attributes {stable_mosaic.version = 11 : i64} {
  func.func @encoder_layer_kernel(%arg0: i32, %arg1: memref<8x32xf32, #tpu.memory_space<vmem>>, %arg2: memref<8x32xf32, #tpu.memory_space<vmem>>, %arg3: memref<1x32xf32, #tpu.memory_space<vmem>>, %arg4: memref<1x32xf32, #tpu.memory_space<vmem>>, %arg5: memref<32x64xbf16, #tpu.memory_space<vmem>>, %arg6: memref<1x64xf32, #tpu.memory_space<vmem>>, %arg7: memref<32x32xbf16, #tpu.memory_space<vmem>>, %arg8: memref<1x32xf32, #tpu.memory_space<vmem>>, %arg9: memref<32x32xbf16, #tpu.memory_space<vmem>>, %arg10: memref<1x32xf32, #tpu.memory_space<vmem>>, %arg11: memref<1x32xf32, #tpu.memory_space<vmem>>, %arg12: memref<1x32xf32, #tpu.memory_space<vmem>>, %arg13: memref<32x128xbf16, #tpu.memory_space<vmem>>, %arg14: memref<1x128xf32, #tpu.memory_space<vmem>>, %arg15: memref<128x32xbf16, #tpu.memory_space<vmem>>, %arg16: memref<1x32xf32, #tpu.memory_space<vmem>>, %arg17: memref<8x32xf32, #tpu.memory_space<vmem>>) attributes {dimension_semantics = [#tpu.dimension_semantics<parallel>], iteration_bounds = array<i64: 2>, scalar_prefetch = 0 : i64, scratch_operands = 0 : i64, tpu.core_type = #tpu.core_type<tc>, window_params = [{transform_indices = @transform_0, window_bounds = array<i64: 8, 32>}, {transform_indices = @transform_1, window_bounds = array<i64: 8, 32>}, {pipeline_mode = #tpu.pipeline_mode<synchronous>, transform_indices = @transform_2, window_bounds = array<i64: 1, 32>}, {pipeline_mode = #tpu.pipeline_mode<synchronous>, transform_indices = @transform_3, window_bounds = array<i64: 1, 32>}, {pipeline_mode = #tpu.pipeline_mode<synchronous>, transform_indices = @transform_4, window_bounds = array<i64: 32, 64>}, {pipeline_mode = #tpu.pipeline_mode<synchronous>, transform_indices = @transform_5, window_bounds = array<i64: 1, 64>}, {pipeline_mode = #tpu.pipeline_mode<synchronous>, transform_indices = @transform_6, window_bounds = array<i64: 32, 32>}, {pipeline_mode = #tpu.pipeline_mode<synchronous>, transform_indices = @transform_7, window_bounds = array<i64: 1, 32>}, {pipeline_mode = #tpu.pipeline_mode<synchronous>, transform_indices = @transform_8, window_bounds = array<i64: 32, 32>}, {pipeline_mode = #tpu.pipeline_mode<synchronous>, transform_indices = @transform_9, window_bounds = array<i64: 1, 32>}, {pipeline_mode = #tpu.pipeline_mode<synchronous>, transform_indices = @transform_10, window_bounds = array<i64: 1, 32>}, {pipeline_mode = #tpu.pipeline_mode<synchronous>, transform_indices = @transform_11, window_bounds = array<i64: 1, 32>}, {pipeline_mode = #tpu.pipeline_mode<synchronous>, transform_indices = @transform_12, window_bounds = array<i64: 32, 128>}, {pipeline_mode = #tpu.pipeline_mode<synchronous>, transform_indices = @transform_13, window_bounds = array<i64: 1, 128>}, {pipeline_mode = #tpu.pipeline_mode<synchronous>, transform_indices = @transform_14, window_bounds = array<i64: 128, 32>}, {pipeline_mode = #tpu.pipeline_mode<synchronous>, transform_indices = @transform_15, window_bounds = array<i64: 1, 32>}, {transform_indices = @transform_16, window_bounds = array<i64: 8, 32>}]} {
    %c0 = arith.constant 0 : index
    %c0_0 = arith.constant 0 : index
    %0 = vector.load %arg1[%c0, %c0_0] : memref<8x32xf32, #tpu.memory_space<vmem>>, vector<8x32xf32>
    %c0_1 = arith.constant 0 : index
    %c0_2 = arith.constant 0 : index
    %1 = vector.load %arg2[%c0_1, %c0_2] : memref<8x32xf32, #tpu.memory_space<vmem>>, vector<8x32xf32>
    %c0_3 = arith.constant 0 : index
    %c0_4 = arith.constant 0 : index
    %2 = vector.load %arg3[%c0_3, %c0_4] : memref<1x32xf32, #tpu.memory_space<vmem>>, vector<1x32xf32>
    %c0_5 = arith.constant 0 : index
    %c0_6 = arith.constant 0 : index
    %3 = vector.load %arg4[%c0_5, %c0_6] : memref<1x32xf32, #tpu.memory_space<vmem>>, vector<1x32xf32>
    %cst = arith.constant dense<0.000000e+00> : vector<8xf32>
    %4 = vector.multi_reduction <add>, %0, %cst [1] : vector<8x32xf32> to vector<8xf32>
    %5 = vector.shape_cast %4 : vector<8xf32> to vector<8x1xf32>
    %cst_7 = arith.constant 3.200000e+01 : f32
    %6 = vector.broadcast %cst_7 : f32 to vector<8x1xf32>
    %7 = arith.divf %5, %6 : vector<8x1xf32>
    %8 = vector.broadcast %7 : vector<8x1xf32> to vector<8x32xf32>
    %9 = arith.subf %0, %8 : vector<8x32xf32>
    %10 = arith.mulf %9, %9 : vector<8x32xf32>
    %cst_8 = arith.constant dense<0.000000e+00> : vector<8xf32>
    %11 = vector.multi_reduction <add>, %10, %cst_8 [1] : vector<8x32xf32> to vector<8xf32>
    %12 = vector.shape_cast %11 : vector<8xf32> to vector<8x1xf32>
    %cst_9 = arith.constant 3.200000e+01 : f32
    %13 = vector.broadcast %cst_9 : f32 to vector<8x1xf32>
    %14 = arith.divf %12, %13 : vector<8x1xf32>
    %15 = vector.broadcast %7 : vector<8x1xf32> to vector<8x32xf32>
    %16 = arith.subf %0, %15 : vector<8x32xf32>
    %cst_10 = arith.constant 9.99999974E-6 : f32
    %17 = vector.broadcast %cst_10 : f32 to vector<8x1xf32>
    %18 = arith.addf %14, %17 : vector<8x1xf32>
    %19 = math.rsqrt %18 : vector<8x1xf32>
    %20 = vector.broadcast %19 : vector<8x1xf32> to vector<8x32xf32>
    %21 = arith.mulf %16, %20 : vector<8x32xf32>
    %22 = vector.broadcast %2 : vector<1x32xf32> to vector<8x32xf32>
    %23 = arith.mulf %21, %22 : vector<8x32xf32>
    %24 = vector.broadcast %3 : vector<1x32xf32> to vector<8x32xf32>
    %25 = arith.addf %23, %24 : vector<8x32xf32>
    %26 = arith.addf %25, %1 : vector<8x32xf32>
    %27 = arith.truncf %26 : vector<8x32xf32> to vector<8x32xbf16>
    %c0_11 = arith.constant 0 : index
    %c0_12 = arith.constant 0 : index
    %28 = vector.load %arg5[%c0_11, %c0_12] : memref<32x64xbf16, #tpu.memory_space<vmem>>, vector<32x64xbf16>
    %cst_13 = arith.constant dense<0.000000e+00> : vector<8x64xf32>
    %29 = tpu.matmul %27, %28, %cst_13 {dimension_numbers = #tpu.dot_dimension_numbers<[1], [0], [0], [1], [0, 0, 1, 1], [], []>} : vector<8x32xbf16>, vector<32x64xbf16>, vector<8x64xf32> -> vector<8x64xf32>
    %c0_14 = arith.constant 0 : index
    %c0_15 = arith.constant 0 : index
    %30 = vector.load %arg6[%c0_14, %c0_15] : memref<1x64xf32, #tpu.memory_space<vmem>>, vector<1x64xf32>
    %31 = vector.broadcast %30 : vector<1x64xf32> to vector<8x64xf32>
    %32 = arith.addf %29, %31 : vector<8x64xf32>
    %33 = arith.truncf %25 : vector<8x32xf32> to vector<8x32xbf16>
    %c0_16 = arith.constant 0 : index
    %c0_17 = arith.constant 0 : index
    %34 = vector.load %arg7[%c0_16, %c0_17] : memref<32x32xbf16, #tpu.memory_space<vmem>>, vector<32x32xbf16>
    %cst_18 = arith.constant dense<0.000000e+00> : vector<8x32xf32>
    %35 = tpu.matmul %33, %34, %cst_18 {dimension_numbers = #tpu.dot_dimension_numbers<[1], [0], [0], [1], [0, 0, 1, 1], [], []>} : vector<8x32xbf16>, vector<32x32xbf16>, vector<8x32xf32> -> vector<8x32xf32>
    %c0_19 = arith.constant 0 : index
    %c0_20 = arith.constant 0 : index
    %36 = vector.load %arg8[%c0_19, %c0_20] : memref<1x32xf32, #tpu.memory_space<vmem>>, vector<1x32xf32>
    %37 = vector.broadcast %36 : vector<1x32xf32> to vector<8x32xf32>
    %38 = arith.addf %35, %37 : vector<8x32xf32>
    %39 = vector.extract_strided_slice %32 {offsets = [0, 0], sizes = [8, 8], strides = [1, 1]} : vector<8x64xf32> to vector<8x8xf32>
    %40 = vector.shape_cast %39 : vector<8x8xf32> to vector<1x8x8xf32>
    %41 = vector.extract_strided_slice %32 {offsets = [0, 8], sizes = [8, 8], strides = [1, 1]} : vector<8x64xf32> to vector<8x8xf32>
    %42 = vector.shape_cast %41 : vector<8x8xf32> to vector<1x8x8xf32>
    %43 = vector.extract_strided_slice %32 {offsets = [0, 16], sizes = [8, 8], strides = [1, 1]} : vector<8x64xf32> to vector<8x8xf32>
    %44 = vector.shape_cast %43 : vector<8x8xf32> to vector<1x8x8xf32>
    %45 = vector.extract_strided_slice %32 {offsets = [0, 24], sizes = [8, 8], strides = [1, 1]} : vector<8x64xf32> to vector<8x8xf32>
    %46 = vector.shape_cast %45 : vector<8x8xf32> to vector<1x8x8xf32>
    %47 = tpu.concatenate %40, %42, %44, %46 in 0 : vector<1x8x8xf32>, vector<1x8x8xf32>, vector<1x8x8xf32>, vector<1x8x8xf32> -> vector<4x8x8xf32>
    %48 = arith.truncf %47 : vector<4x8x8xf32> to vector<4x8x8xbf16>
    %49 = vector.extract_strided_slice %32 {offsets = [0, 32], sizes = [8, 8], strides = [1, 1]} : vector<8x64xf32> to vector<8x8xf32>
    %50 = vector.shape_cast %49 : vector<8x8xf32> to vector<1x8x8xf32>
    %51 = vector.extract_strided_slice %32 {offsets = [0, 40], sizes = [8, 8], strides = [1, 1]} : vector<8x64xf32> to vector<8x8xf32>
    %52 = vector.shape_cast %51 : vector<8x8xf32> to vector<1x8x8xf32>
    %53 = vector.extract_strided_slice %32 {offsets = [0, 48], sizes = [8, 8], strides = [1, 1]} : vector<8x64xf32> to vector<8x8xf32>
    %54 = vector.shape_cast %53 : vector<8x8xf32> to vector<1x8x8xf32>
    %55 = vector.extract_strided_slice %32 {offsets = [0, 56], sizes = [8, 8], strides = [1, 1]} : vector<8x64xf32> to vector<8x8xf32>
    %56 = vector.shape_cast %55 : vector<8x8xf32> to vector<1x8x8xf32>
    %57 = tpu.concatenate %50, %52, %54, %56 in 0 : vector<1x8x8xf32>, vector<1x8x8xf32>, vector<1x8x8xf32>, vector<1x8x8xf32> -> vector<4x8x8xf32>
    %58 = arith.truncf %57 : vector<4x8x8xf32> to vector<4x8x8xbf16>
    %59 = vector.extract_strided_slice %38 {offsets = [0, 0], sizes = [8, 8], strides = [1, 1]} : vector<8x32xf32> to vector<8x8xf32>
    %60 = vector.shape_cast %59 : vector<8x8xf32> to vector<1x8x8xf32>
    %61 = vector.extract_strided_slice %38 {offsets = [0, 8], sizes = [8, 8], strides = [1, 1]} : vector<8x32xf32> to vector<8x8xf32>
    %62 = vector.shape_cast %61 : vector<8x8xf32> to vector<1x8x8xf32>
    %63 = vector.extract_strided_slice %38 {offsets = [0, 16], sizes = [8, 8], strides = [1, 1]} : vector<8x32xf32> to vector<8x8xf32>
    %64 = vector.shape_cast %63 : vector<8x8xf32> to vector<1x8x8xf32>
    %65 = vector.extract_strided_slice %38 {offsets = [0, 24], sizes = [8, 8], strides = [1, 1]} : vector<8x32xf32> to vector<8x8xf32>
    %66 = vector.shape_cast %65 : vector<8x8xf32> to vector<1x8x8xf32>
    %67 = tpu.concatenate %60, %62, %64, %66 in 0 : vector<1x8x8xf32>, vector<1x8x8xf32>, vector<1x8x8xf32>, vector<1x8x8xf32> -> vector<4x8x8xf32>
    %68 = arith.truncf %67 : vector<4x8x8xf32> to vector<4x8x8xbf16>
    "tpu.trace_start"() <{level = 10 : i32, message = "bnd,bmd->bnm"}> : () -> ()
    %cst_21 = arith.constant dense<0.000000e+00> : vector<4x8x8xf32>
    %69 = tpu.matmul %48, %58, %cst_21 {dimension_numbers = #tpu.dot_dimension_numbers<[2], [2], [1], [1], [0, 0, 0, 1, 1, 1], [0], [0]>} : vector<4x8x8xbf16>, vector<4x8x8xbf16>, vector<4x8x8xf32> -> vector<4x8x8xf32>
    "tpu.trace_stop"() : () -> ()
    %cst_22 = arith.constant dense<0xFF800000> : vector<4x8xf32>
    %70 = vector.multi_reduction <maximumf>, %69, %cst_22 [2] : vector<4x8x8xf32> to vector<4x8xf32>
    %71 = vector.shape_cast %70 : vector<4x8xf32> to vector<4x8x1xf32>
    %72 = vector.broadcast %71 : vector<4x8x1xf32> to vector<4x8x8xf32>
    %73 = arith.subf %69, %72 : vector<4x8x8xf32>
    %74 = math.exp %73 : vector<4x8x8xf32>
    %cst_23 = arith.constant dense<0.000000e+00> : vector<4x8xf32>
    %75 = vector.multi_reduction <add>, %74, %cst_23 [2] : vector<4x8x8xf32> to vector<4x8xf32>
    %76 = vector.shape_cast %75 : vector<4x8xf32> to vector<4x8x1xf32>
    %77 = tpu.reciprocal %76 {approx = true} : vector<4x8x1xf32> -> vector<4x8x1xf32>
    %78 = vector.broadcast %77 : vector<4x8x1xf32> to vector<4x8x8xf32>
    %79 = arith.mulf %74, %78 : vector<4x8x8xf32>
    %80 = arith.truncf %79 : vector<4x8x8xf32> to vector<4x8x8xbf16>
    "tpu.trace_start"() <{level = 10 : i32, message = "bnm,bmd->bnd"}> : () -> ()
    %cst_24 = arith.constant dense<0.000000e+00> : vector<4x8x8xf32>
    %81 = tpu.matmul %80, %68, %cst_24 {dimension_numbers = #tpu.dot_dimension_numbers<[2], [1], [1], [2], [0, 0, 0, 1, 1, 2], [0], [0]>} : vector<4x8x8xbf16>, vector<4x8x8xbf16>, vector<4x8x8xf32> -> vector<4x8x8xf32>
    "tpu.trace_stop"() : () -> ()
    %82 = vector.extract_strided_slice %81 {offsets = [0, 0, 0], sizes = [1, 8, 8], strides = [1, 1, 1]} : vector<4x8x8xf32> to vector<1x8x8xf32>
    %83 = vector.shape_cast %82 : vector<1x8x8xf32> to vector<8x8xf32>
    %84 = vector.extract_strided_slice %81 {offsets = [1, 0, 0], sizes = [1, 8, 8], strides = [1, 1, 1]} : vector<4x8x8xf32> to vector<1x8x8xf32>
    %85 = vector.shape_cast %84 : vector<1x8x8xf32> to vector<8x8xf32>
    %86 = vector.extract_strided_slice %81 {offsets = [2, 0, 0], sizes = [1, 8, 8], strides = [1, 1, 1]} : vector<4x8x8xf32> to vector<1x8x8xf32>
    %87 = vector.shape_cast %86 : vector<1x8x8xf32> to vector<8x8xf32>
    %88 = vector.extract_strided_slice %81 {offsets = [3, 0, 0], sizes = [1, 8, 8], strides = [1, 1, 1]} : vector<4x8x8xf32> to vector<1x8x8xf32>
    %89 = vector.shape_cast %88 : vector<1x8x8xf32> to vector<8x8xf32>
    %90 = tpu.concatenate %83, %85, %87, %89 in 1 : vector<8x8xf32>, vector<8x8xf32>, vector<8x8xf32>, vector<8x8xf32> -> vector<8x32xf32>
    %91 = arith.truncf %90 : vector<8x32xf32> to vector<8x32xbf16>
    %c0_25 = arith.constant 0 : index
    %c0_26 = arith.constant 0 : index
    %92 = vector.load %arg9[%c0_25, %c0_26] : memref<32x32xbf16, #tpu.memory_space<vmem>>, vector<32x32xbf16>
    %cst_27 = arith.constant dense<0.000000e+00> : vector<8x32xf32>
    %93 = tpu.matmul %91, %92, %cst_27 {dimension_numbers = #tpu.dot_dimension_numbers<[1], [0], [0], [1], [0, 0, 1, 1], [], []>} : vector<8x32xbf16>, vector<32x32xbf16>, vector<8x32xf32> -> vector<8x32xf32>
    %c0_28 = arith.constant 0 : index
    %c0_29 = arith.constant 0 : index
    %94 = vector.load %arg10[%c0_28, %c0_29] : memref<1x32xf32, #tpu.memory_space<vmem>>, vector<1x32xf32>
    %95 = vector.broadcast %94 : vector<1x32xf32> to vector<8x32xf32>
    %96 = arith.addf %93, %95 : vector<8x32xf32>
    %97 = arith.addf %0, %96 : vector<8x32xf32>
    %c0_30 = arith.constant 0 : index
    %c0_31 = arith.constant 0 : index
    %98 = vector.load %arg11[%c0_30, %c0_31] : memref<1x32xf32, #tpu.memory_space<vmem>>, vector<1x32xf32>
    %c0_32 = arith.constant 0 : index
    %c0_33 = arith.constant 0 : index
    %99 = vector.load %arg12[%c0_32, %c0_33] : memref<1x32xf32, #tpu.memory_space<vmem>>, vector<1x32xf32>
    %cst_34 = arith.constant dense<0.000000e+00> : vector<8xf32>
    %100 = vector.multi_reduction <add>, %97, %cst_34 [1] : vector<8x32xf32> to vector<8xf32>
    %101 = vector.shape_cast %100 : vector<8xf32> to vector<8x1xf32>
    %cst_35 = arith.constant 3.200000e+01 : f32
    %102 = vector.broadcast %cst_35 : f32 to vector<8x1xf32>
    %103 = arith.divf %101, %102 : vector<8x1xf32>
    %104 = vector.broadcast %103 : vector<8x1xf32> to vector<8x32xf32>
    %105 = arith.subf %97, %104 : vector<8x32xf32>
    %106 = arith.mulf %105, %105 : vector<8x32xf32>
    %cst_36 = arith.constant dense<0.000000e+00> : vector<8xf32>
    %107 = vector.multi_reduction <add>, %106, %cst_36 [1] : vector<8x32xf32> to vector<8xf32>
    %108 = vector.shape_cast %107 : vector<8xf32> to vector<8x1xf32>
    %cst_37 = arith.constant 3.200000e+01 : f32
    %109 = vector.broadcast %cst_37 : f32 to vector<8x1xf32>
    %110 = arith.divf %108, %109 : vector<8x1xf32>
    %111 = vector.broadcast %103 : vector<8x1xf32> to vector<8x32xf32>
    %112 = arith.subf %97, %111 : vector<8x32xf32>
    %cst_38 = arith.constant 9.99999974E-6 : f32
    %113 = vector.broadcast %cst_38 : f32 to vector<8x1xf32>
    %114 = arith.addf %110, %113 : vector<8x1xf32>
    %115 = math.rsqrt %114 : vector<8x1xf32>
    %116 = vector.broadcast %115 : vector<8x1xf32> to vector<8x32xf32>
    %117 = arith.mulf %112, %116 : vector<8x32xf32>
    %118 = vector.broadcast %98 : vector<1x32xf32> to vector<8x32xf32>
    %119 = arith.mulf %117, %118 : vector<8x32xf32>
    %120 = vector.broadcast %99 : vector<1x32xf32> to vector<8x32xf32>
    %121 = arith.addf %119, %120 : vector<8x32xf32>
    %122 = arith.truncf %121 : vector<8x32xf32> to vector<8x32xbf16>
    %c0_39 = arith.constant 0 : index
    %c0_40 = arith.constant 0 : index
    %123 = vector.load %arg13[%c0_39, %c0_40] : memref<32x128xbf16, #tpu.memory_space<vmem>>, vector<32x128xbf16>
    %cst_41 = arith.constant dense<0.000000e+00> : vector<8x128xf32>
    %124 = tpu.matmul %122, %123, %cst_41 {dimension_numbers = #tpu.dot_dimension_numbers<[1], [0], [0], [1], [0, 0, 1, 1], [], []>} : vector<8x32xbf16>, vector<32x128xbf16>, vector<8x128xf32> -> vector<8x128xf32>
    %c0_42 = arith.constant 0 : index
    %c0_43 = arith.constant 0 : index
    %125 = vector.load %arg14[%c0_42, %c0_43] : memref<1x128xf32, #tpu.memory_space<vmem>>, vector<1x128xf32>
    %126 = vector.broadcast %125 : vector<1x128xf32> to vector<8x128xf32>
    %127 = arith.addf %124, %126 : vector<8x128xf32>
    %128 = arith.mulf %127, %127 : vector<8x128xf32>
    %129 = arith.mulf %127, %128 : vector<8x128xf32>
    %cst_44 = arith.constant 4.471500e-02 : f32
    %130 = vector.broadcast %cst_44 : f32 to vector<8x128xf32>
    %131 = arith.mulf %130, %129 : vector<8x128xf32>
    %132 = arith.addf %127, %131 : vector<8x128xf32>
    %cst_45 = arith.constant 0.797884583 : f32
    %133 = vector.broadcast %cst_45 : f32 to vector<8x128xf32>
    %134 = arith.mulf %133, %132 : vector<8x128xf32>
    %135 = math.tanh %134 : vector<8x128xf32>
    %cst_46 = arith.constant 1.000000e+00 : f32
    %136 = vector.broadcast %cst_46 : f32 to vector<8x128xf32>
    %137 = arith.addf %136, %135 : vector<8x128xf32>
    %cst_47 = arith.constant 5.000000e-01 : f32
    %138 = vector.broadcast %cst_47 : f32 to vector<8x128xf32>
    %139 = arith.mulf %138, %137 : vector<8x128xf32>
    %140 = arith.mulf %127, %139 : vector<8x128xf32>
    %141 = arith.truncf %140 : vector<8x128xf32> to vector<8x128xbf16>
    %c0_48 = arith.constant 0 : index
    %c0_49 = arith.constant 0 : index
    %142 = vector.load %arg15[%c0_48, %c0_49] : memref<128x32xbf16, #tpu.memory_space<vmem>>, vector<128x32xbf16>
    %cst_50 = arith.constant dense<0.000000e+00> : vector<8x32xf32>
    %143 = tpu.matmul %141, %142, %cst_50 {dimension_numbers = #tpu.dot_dimension_numbers<[1], [0], [0], [1], [0, 0, 1, 1], [], []>} : vector<8x128xbf16>, vector<128x32xbf16>, vector<8x32xf32> -> vector<8x32xf32>
    %c0_51 = arith.constant 0 : index
    %c0_52 = arith.constant 0 : index
    %144 = vector.load %arg16[%c0_51, %c0_52] : memref<1x32xf32, #tpu.memory_space<vmem>>, vector<1x32xf32>
    %145 = vector.broadcast %144 : vector<1x32xf32> to vector<8x32xf32>
    %146 = arith.addf %143, %145 : vector<8x32xf32>
    %147 = arith.addf %97, %146 : vector<8x32xf32>
    %c0_53 = arith.constant 0 : index
    %c0_54 = arith.constant 0 : index
    %148 = vector.load %arg17[%c0_53, %c0_54] : memref<8x32xf32, #tpu.memory_space<vmem>>, vector<8x32xf32>
    tpu.vector_store %arg17[%c0_53, %c0_54], %147 {strides = array<i32>} : memref<8x32xf32, #tpu.memory_space<vmem>>, vector<8x32xf32>,
    return
  }
  func.func @transform_0(%arg0: i32) -> (i32, i32) {
    %c0_i32 = arith.constant 0 : i32
    %c0_i32_0 = arith.constant 0 : i32
    return %arg0, %c0_i32 : i32, i32
  }
  func.func @transform_1(%arg0: i32) -> (i32, i32) {
    %c0_i32 = arith.constant 0 : i32
    %c0_i32_0 = arith.constant 0 : i32
    return %arg0, %c0_i32 : i32, i32
  }
  func.func @transform_2(%arg0: i32) -> (i32, i32) {
    %c0_i32 = arith.constant 0 : i32
    %c0_i32_0 = arith.constant 0 : i32
    %c0_i32_1 = arith.constant 0 : i32
    return %c0_i32, %c0_i32_0 : i32, i32
  }
  func.func @transform_3(%arg0: i32) -> (i32, i32) {
    %c0_i32 = arith.constant 0 : i32
    %c0_i32_0 = arith.constant 0 : i32
    %c0_i32_1 = arith.constant 0 : i32
    return %c0_i32, %c0_i32_0 : i32, i32
  }
  func.func @transform_4(%arg0: i32) -> (i32, i32) {
    %c0_i32 = arith.constant 0 : i32
    %c0_i32_0 = arith.constant 0 : i32
    %c0_i32_1 = arith.constant 0 : i32
    return %c0_i32, %c0_i32_0 : i32, i32
  }
  func.func @transform_5(%arg0: i32) -> (i32, i32) {
    %c0_i32 = arith.constant 0 : i32
    %c0_i32_0 = arith.constant 0 : i32
    %c0_i32_1 = arith.constant 0 : i32
    return %c0_i32, %c0_i32_0 : i32, i32
  }
  func.func @transform_6(%arg0: i32) -> (i32, i32) {
    %c0_i32 = arith.constant 0 : i32
    %c0_i32_0 = arith.constant 0 : i32
    %c0_i32_1 = arith.constant 0 : i32
    return %c0_i32, %c0_i32_0 : i32, i32
  }
  func.func @transform_7(%arg0: i32) -> (i32, i32) {
    %c0_i32 = arith.constant 0 : i32
    %c0_i32_0 = arith.constant 0 : i32
    %c0_i32_1 = arith.constant 0 : i32
    return %c0_i32, %c0_i32_0 : i32, i32
  }
  func.func @transform_8(%arg0: i32) -> (i32, i32) {
    %c0_i32 = arith.constant 0 : i32
    %c0_i32_0 = arith.constant 0 : i32
    %c0_i32_1 = arith.constant 0 : i32
    return %c0_i32, %c0_i32_0 : i32, i32
  }
  func.func @transform_9(%arg0: i32) -> (i32, i32) {
    %c0_i32 = arith.constant 0 : i32
    %c0_i32_0 = arith.constant 0 : i32
    %c0_i32_1 = arith.constant 0 : i32
    return %c0_i32, %c0_i32_0 : i32, i32
  }
  func.func @transform_10(%arg0: i32) -> (i32, i32) {
    %c0_i32 = arith.constant 0 : i32
    %c0_i32_0 = arith.constant 0 : i32
    %c0_i32_1 = arith.constant 0 : i32
    return %c0_i32, %c0_i32_0 : i32, i32
  }
  func.func @transform_11(%arg0: i32) -> (i32, i32) {
    %c0_i32 = arith.constant 0 : i32
    %c0_i32_0 = arith.constant 0 : i32
    %c0_i32_1 = arith.constant 0 : i32
    return %c0_i32, %c0_i32_0 : i32, i32
  }
  func.func @transform_12(%arg0: i32) -> (i32, i32) {
    %c0_i32 = arith.constant 0 : i32
    %c0_i32_0 = arith.constant 0 : i32
    %c0_i32_1 = arith.constant 0 : i32
    return %c0_i32, %c0_i32_0 : i32, i32
  }
  func.func @transform_13(%arg0: i32) -> (i32, i32) {
    %c0_i32 = arith.constant 0 : i32
    %c0_i32_0 = arith.constant 0 : i32
    %c0_i32_1 = arith.constant 0 : i32
    return %c0_i32, %c0_i32_0 : i32, i32
  }
  func.func @transform_14(%arg0: i32) -> (i32, i32) {
    %c0_i32 = arith.constant 0 : i32
    %c0_i32_0 = arith.constant 0 : i32
    %c0_i32_1 = arith.constant 0 : i32
    return %c0_i32, %c0_i32_0 : i32, i32
  }
  func.func @transform_15(%arg0: i32) -> (i32, i32) {
    %c0_i32 = arith.constant 0 : i32
    %c0_i32_0 = arith.constant 0 : i32
    %c0_i32_1 = arith.constant 0 : i32
    return %c0_i32, %c0_i32_0 : i32, i32
  }
  func.func @transform_16(%arg0: i32) -> (i32, i32) {
    %c0_i32 = arith.constant 0 : i32
    %c0_i32_0 = arith.constant 0 : i32
    return %arg0, %c0_i32 : i32, i32
  }
}

</mosaic_0001>

<bundles_post_ra>
// kernel: tpu_custom_call.1
= control target key start
LH: loop header
LB: loop body
LE: loop exit
PB: predicated region body
PF: predicated region fallthrough
CT: control target
= control target key end

     0   :  { %s2563_s0 = inlined_call_operand.vmem [shape: f32[16,32], index: 0, kind: input, shape index: {}]   ;;  %s2564_s1 = inlined_call_operand.vmem [shape: f32[16,32], index: 1, kind: input, shape index: {}]   ;;  %s2565_s2 = inlined_call_operand.vmem [shape: f32[1,32], index: 2, kind: input, shape index: {}]   ;;  %s2566_s3 = inlined_call_operand.vmem [shape: f32[1,32], index: 3, kind: input, shape index: {}]   ;;  %s2567_s4 = inlined_call_operand.vmem [shape: bf16[32,64], index: 4, kind: input, shape index: {}]   ;;  %s2568_s5 = inlined_call_operand.hbm [shape: f32[1,64], index: 5, kind: input, shape index: {}]   ;;  %s2569_s6 = inlined_call_operand.vmem [shape: bf16[32,32], index: 6, kind: input, shape index: {}]   ;;  %s2570_s7 = inlined_call_operand.hbm [shape: f32[1,32], index: 7, kind: input, shape index: {}]   ;;  %s2571_s8 = inlined_call_operand.vmem [shape: bf16[32,32], index: 8, kind: input, shape index: {}]   ;;  %s2572_s9 = inlined_call_operand.hbm [shape: f32[1,32], index: 9, kind: input, shape index: {}]   ;;  %s2573_s10 = inlined_call_operand.vmem [shape: f32[1,32], index: 10, kind: input, shape index: {}]   ;;  %s2574_s11 = inlined_call_operand.vmem [shape: f32[1,32], index: 11, kind: input, shape index: {}]   ;;  %s2575_s12 = inlined_call_operand.vmem [shape: bf16[32,128], index: 12, kind: input, shape index: {}]   ;;  %s2576_s13 = inlined_call_operand.vmem [shape: f32[1,128], index: 13, kind: input, shape index: {}]   ;;  %s2577_s14 = inlined_call_operand.vmem [shape: bf16[128,32], index: 14, kind: input, shape index: {}]   ;;  %s2578_s15 = inlined_call_operand.vmem [shape: f32[1,32], index: 15, kind: input, shape index: {}]   ;;  %s2579_s16 = inlined_call_operand.hbm [shape: f32[16,32], index: 16, kind: output, shape index: {}]  }
   0x1   :  { %2592 = sst [smem:[#allocation19_spill]] %s2563_s0 }
   0x2   :  { %2593 = sst [smem:[#allocation20_spill]] %s2578_s15 }
   0x3   :  { %2594 = sst [smem:[#allocation21_spill]] %s2579_s16 }
   0x4   :  { %21 = vsyncpa [#allocation3], 0 }
   0x5   :  { %22 = vsyncpa [#allocation6], 0 }
   0x6   :  { %23 = vsyncpa [#allocation4], 0 }
   0x7   :  { %25 = vsyncpa [#allocation4 + $0x1], 0  ;;  %s2181_s21 = smov 0   ;;  %s2183_s22 = smov 0  }
   0x8   :  { %s2185_s23 = smov 0   ;;  %s2187_s24 = smov 0  }
   0x9 LB: > { %2595 = sst [smem:[#allocation12_spill]] %s2069_s21  ;;  %s2202_s25 = sadd.s32 4294967295, %s2081_s24   ;;  %s2081_s24 = sphi %s2187_s24, %s2622_s24   ;;  %s2077_s23 = sphi %s2185_s23, %s2624_s23   ;;  %s2073_s22 = sphi %s2183_s22, %s2626_s22   ;;  %s2069_s21 = sphi %s2181_s21, %s2625_s21  }
   0xa   : > { %2596 = sst [smem:[#allocation13_spill]] %s2077_s23  ;;  %s1619_s26 = sadd.s32 4294967294, %s2081_s24  }
   0xb   : > { %2597 = sst [smem:[#allocation14_spill]] %s2081_s24  ;;  %s2206_s27 = sadd.s32 1, %s2081_s24  }
   0xc   : > { %2598 = sst [smem:[#allocation15_spill]] %s2206_s27  ;;  %s384_s28 = sadd.s32 1, %s2077_s23 }
   0xd   : > { %s381_s29 = ssub.s32 %s2081_s24, %s2206_s27  ;;  %p394_p0 = scmp.ne.s32.totalorder %s2077_s23, %s2073_s22 }
   0xe   : > { %p382_p1 = scmp.eq.s32.totalorder %s381_s29, 0  ;;  %p395_p2 = scmp.eq.s32.totalorder %s2202_s25, 1 }
   0xf   : > { %p400_p3 = scmp.ne.s32.totalorder %s2073_s22, %s2069_s21  ;;  %p401_p4 = scmp.eq.s32.totalorder %s1619_s26, 1 }
  0x10   : > { %s2217_s30 = scalar_select %p382_p1, %s2077_s23, %s384_s28  }
  0x11   : > { %p2219_p5 = por %p395_p2, %p394_p0  ;;  %p2223_p6 = por %p401_p4, %p400_p3 }
  0x12   : > { %2599 = sst [smem:[#allocation16_spill]] %s2217_s30  ;;  %p1620_p7 = scmp.ge.s32.totalorder %s2081_s24, 1 }
  0x13   : > { %s2600_s0 = scalar_select %p2219_p5, 1, 0 }
  0x14   : > { %s2602_s17 = scalar_select %p2223_p6, 1, 0 }
  0x15   : > { %2601 = sst [smem:[#allocation17_spill]] %s2600_s0  ;;  %p408_p8 = scmp.lt.s32.totalorder %s2081_s24, 3 }
  0x16   : > { %2603 = sst [smem:[#allocation18_spill]] %s2602_s17  ;;  %p2587_p9 = scmp.eq.s32.totalorder %s2202_s25, 0 }
  0x17   : > { %p2230_p10 = pnand %p1620_p7, %p408_p8  ;;  %s2083_s19 = smov [#allocation5]  }
  0x18   : > { %s444_s20 = sshll.u32 %s2083_s19, 4  ;;  %s2084_s26 = smov [#allocation2]   ;;  %s445_s20 = int_to_ptr.vmem [resolvable:$true] %s444_s20 }
  0x19   : > { %s2604_s18 = scalar_select %p2230_p10, 1, 0 }
  0x1a   : > { %p1824_p11 = pneg %p2230_p10  ;;  %s430_s28 = sshll.u32 %s2084_s26, 4  ;;  %s2242_s28 = int_to_ptr.vmem [resolvable:$true] %s430_s28 }
  0x1b   : > { %s2085_s30 = smov [#allocation7]   ;;  %s1927_s19 = scalar_lea.hbm %s2570_s7, 16 }
  0x1c   : > { %p2238_p12 = pnand %p2587_p9, %p1824_p11  ;;  %s458_s23 = sshll.u32 %s2085_s30, 4  ;;  %s2244_s23 = int_to_ptr.vmem [resolvable:$true] %s458_s23 }
  0x1d   : > { %p1928_p13 = scmp.ne.s32.totalorder %s2570_s7, %s1927_s19  ;;  %p1934_p3 = scmp.lt.u32.totalorder %s1927_s19, %s2570_s7 }
  0x1e   : > { %p2254_p0 = pneg %p2238_p12 }
  0x20   : > { %p1930_p1 = pnand %p2254_p0, %p1928_p13 }
  0x22   : > { %p1931_p2 = pneg %p1930_p1 }
  0x24   : > { %p1936_p4 = pnand %p1934_p3, %p1931_p2 }
  0x26   : > { %1939 = shalt.err (!%p1936_p4)
}
  0x27   : > { %s1940_s27 = scalar_lea.vmem %s445_s20, 16  ;;  %s1947_s21 = scalar_lea.vmem %s445_s20, 32 }
  0x28   : > { %p1941_p7 = scmp.ne.s32.totalorder %s445_s20, %s1940_s27  ;;  %p1948_p9 = scmp.lt.s32.totalorder %s445_s20, %s445_s20 }
  0x29   : > { %p1949_p6 = scmp.lt.s32.totalorder %s1947_s21, %s1940_s27 }
  0x2a   : > { %p1943_p8 = pnand %p1941_p7, %p2254_p0 }
  0x2b   : > { %p1950_p5 = por %p1949_p6, %p1948_p9 }
  0x2c   : > { %p1944_p11 = pneg %p1943_p8 }
  0x2e   : > { %p1951_p10 = pnand %p1950_p5, %p1944_p11 }
  0x30   : > { %1954 = shalt.err (!%p1951_p10)
}
  0x31   : > { %1830 = dma.hbm_to_vmem [thread:$0]  (!%p2238_p12), %s2570_s7, 16, %s445_s20, [#allocation6]  }
  0x32   : > { %s1955_s30 = scalar_lea.hbm %s2568_s5, 16 }
  0x33   : > { %p1956_p13 = scmp.ne.s32.totalorder %s2568_s5, %s1955_s30  ;;  %p1962_p5 = scmp.lt.u32.totalorder %s1955_s30, %s2568_s5 }
  0x35   : > { %p1958_p1 = pnand %p1956_p13, %p2254_p0 }
  0x37   : > { %p1959_p6 = pneg %p1958_p1 }
  0x39   : > { %p1964_p9 = pnand %p1962_p5, %p1959_p6 }
  0x3b   : > { %1967 = shalt.err (!%p1964_p9)
}
  0x3c   : > { %s1968_s20 = scalar_lea.vmem %s2242_s28, 16  ;;  %s1975_s15 = scalar_lea.vmem %s2242_s28, 32 }
  0x3d   : > { %p1969_p10 = scmp.ne.s32.totalorder %s2242_s28, %s1968_s20  ;;  %p1976_p4 = scmp.lt.s32.totalorder %s2242_s28, %s2242_s28 }
  0x3e   : > { %p1977_p7 = scmp.lt.s32.totalorder %s1975_s15, %s1968_s20 }
  0x3f   : > { %p1971_p2 = pnand %p1969_p10, %p2254_p0 }
  0x40   : > { %p1978_p8 = por %p1977_p7, %p1976_p4 }
  0x41   : > { %p1972_p3 = pneg %p1971_p2 }
  0x43   : > { %p1979_p11 = pnand %p1978_p8, %p1972_p3 }
  0x45   : > { %1982 = shalt.err (!%p1979_p11)
}
  0x46   : > { %1827 = dma.hbm_to_vmem [thread:$0]  (!%p2238_p12), %s2568_s5, 16, %s2242_s28, [#allocation3]  }
  0x47   : > { %s1983_s19 = scalar_lea.hbm %s2572_s9, 16 }
  0x48   : > { %p1984_p13 = scmp.ne.s32.totalorder %s2572_s9, %s1983_s19  ;;  %p1990_p5 = scmp.lt.u32.totalorder %s1983_s19, %s2572_s9 }
  0x4a   : > { %p1986_p1 = pnand %p1984_p13, %p2254_p0 }
  0x4c   : > { %p1987_p6 = pneg %p1986_p1 }
  0x4e   : > { %p1992_p9 = pnand %p1990_p5, %p1987_p6 }
  0x50   : > { %1995 = shalt.err (!%p1992_p9)
}
  0x51   : > { %s1996_s28 = scalar_lea.vmem %s2244_s23, 16  ;;  %s2003_s15 = scalar_lea.vmem %s2244_s23, 32 }
  0x52   : > { %p1997_p10 = scmp.ne.s32.totalorder %s2244_s23, %s1996_s28  ;;  %p2004_p4 = scmp.lt.s32.totalorder %s2244_s23, %s2244_s23 }
  0x53   : > { %p2005_p7 = scmp.lt.s32.totalorder %s2003_s15, %s1996_s28 }
  0x54   : > { %p1999_p2 = pnand %p1997_p10, %p2254_p0 }
  0x55   : > { %p2006_p8 = por %p2005_p7, %p2004_p4 }
  0x56   : > { %p2000_p3 = pneg %p1999_p2 }
  0x58   : > { %p2007_p11 = pnand %p2006_p8, %p2000_p3 }
  0x5a   : > { %2010 = shalt.err (!%p2007_p11)
}
  0x5b   : > { %1833 = dma.hbm_to_vmem [thread:$0]  (!%p2238_p12), %s2572_s9, 16, %s2244_s23, [#allocation6]  }
  0x5c   : > { %p2607_p13 = scmp.ne.s32.totalorder %s2604_s18, 0 }
  0x5d   : > { %p2608_p0 = scmp.eq.s32.totalorder (!%p2607_p13), %s2202_s25, 0 }
  0x5e   : > { %503 = sbr.rel (%p2607_p13) target bundleno = 2754 (0xac2), region = 84 }
  0x65   : > { %2056 = dma.done.wait (%p2608_p0), [#allocation3], 16   ;;  %p2609_p1 = pmov %p2608_p0 }
  0x66   : > { %p2610_p6 = pmov %p2608_p0 }
  0x67   : > { %2058 = vsyncadd (%p2609_p1), [#allocation3], 4294967280 }
  0x68   : > { %2060 = dma.done.wait (%p2610_p6), [#allocation6], 32   ;;  %p2611_p5 = pmov %p2608_p0 }
  0x69   : > { %p564_p9 = scmp.lt.s32.totalorder %s2202_s25, 1  ;;  %s2612_s17 = sld [smem:[#allocation19_spill]]  ;;  %vm577_vm0 = vcmask 261120   ;;  %v1889_v7 = vld [vmem:[%s2567_s4] sm:$0xff]   ;;  %v2086_v8 = vmov 0.0   ;;  %vm2087_vm1 = vmmov 0  }
  0x6a   : > { %2062 = vsyncadd (%p2611_p5), [#allocation6], 4294967264  ;;  %1710 = vmatprep.subr.bf16.mxu1 %v2086_v8  ;;  %1714 = vmatprep.mubr.msk.bf16.mxu1 %vm2087_vm1, %v2086_v8  ;;  %v1890_v9 = vld [vmem:[%s2567_s4 + $0x8] sm:$0xff]   ;;  %v1632_v14 = vld [vmem:[%s2565_s2] ss:$0 sm:$0xff]  ;;  %s2089_s30 = smov 120  }
  0x6b   : > { %s2330_s29 = scalar_select %p564_p9, %s2202_s25, 1  ;;  %1711 = vmatpush3.bf16.msra.mxu1 %v1889_v7  ;;  %1738 = vmatprep.subr.bf16.mxu0 %v2086_v8  ;;  %v1633_v16 = vld [vmem:[%s2566_s3] ss:$0 sm:$0xff]  ;;  %v1892_v23 = vld [vmem:[%s2569_s6 + $0x8] sm:$0xff]   ;;  %vm772_vm2 = vcmask 64512   ;;  %vm1017_vm3 = vcmask 1043456  }
  0x6c   : > { %1712 = vmatprep.subr.bf16.mxu1 %v2086_v8  ;;  %1740 = vmatprep.mubr.msk.bf16.mxu0 %vm2087_vm1, %v2086_v8  ;;  %v1891_v21 = vld [vmem:[%s2569_s6] sm:$0xff]   ;;  %s2090_s27 = smov 112   ;;  %s2091_s21 = smov 96   ;;  %vm1212_vm4 = vcmask 130048   ;;  %vm1214_vm5 = vcmask 195584  }
  0x6d   : > { %s1630_s23 = sshll.u32 %s2330_s29, 3  ;;  %v1634_v25 = vld [vmem:[#allocation2] ss:$0 sm:$0xff]  ;;  %v1638_v46 = vld [vmem:[#allocation5] ss:$0 sm:$0xff]  ;;  %s2093_s18 = smov 16  }
  0x6e   : > { %s571_s24 = scalar_lea.vmem %s2564_s1, %s1630_s23  ;;  %s2094_s26 = smov 24  }
  0x6f   : > { %s567_s16 = scalar_lea.vmem %s2612_s17, %s1630_s23  ;;  %1713 = vmatpush3.bf16.msra.mxu1 %v1890_v9  ;;  %v574_v18 = vld [vmem:[%s571_s24] sm:$0xff]  ;;  %s2088_s23 = smov 104  }
  0x70   : > { %v2338_v0 = vld [vmem:[%s567_s16] sm:$0xff]  ;;  %1718 = vmatprep.subr.bf16.mxu1 %v2086_v8  ;;  %s2092_s24 = smov 8   ;;  %s561_s0 = sand.u32 1, %s2073_s22  }
  0x71   : > { %v578_v1 = vsel %vm577_vm0, %v2338_v0, 0.0  ;;  %s2613_s17 = sld [smem:[#allocation20_spill]]  ;;  %s2614_s16 = sld [smem:[#allocation17_spill]] }
  0x72   : > { %579 = vadd.xlane.f32.xlu0 %v578_v1  ;;  %s1670_s29 = sshll.u32 %s2202_s25, 7  ;;  %s1504_s25 = scalar_lea.sflag [#allocation4], %s561_s0 }
  0x77   : > { %p2617_p10 = scmp.ne.s32.totalorder %s2614_s16, 0 }
  0xff   : > { %v580_v2 = vpop.xlane.xlu0 %579 }
 0x100   : > { %v582_v3 = vmul.f32 0.03125, %v580_v2 }
 0x102   : > { %v583_v4 = vsub.f32 %v2338_v0, %v582_v3 }
 0x104   : > { %v584_v5 = vmul.f32 %v583_v4, %v583_v4 }
 0x106   : > { %v585_v6 = vsel %vm577_vm0, %v584_v5, 0.0 }
 0x107   : > { %586 = vadd.xlane.f32.xlu0 %v585_v6 }
 0x194   : > { %v587_v10 = vpop.xlane.xlu0 %586 }
 0x195   : > { %v588_v11 = vmul.f32 0.03125, %v587_v10 }
 0x197   : > { %v589_v12 = vadd.f32 1e-05, %v588_v11 }
 0x199   : > { %1905 = vrsqrt.f32 %v589_v12 }
 0x1a3   : > { %v1906_v13 = vpop.eup %1905 }
 0x1a4   : > { %v591_v15 = vmul.f32 %v1906_v13, %v583_v4 }
 0x1a6   : > { %v598_v17 = vmul.f32 %v1632_v14, %v591_v15 }
 0x1a8   : > { %v605_v19 = vadd.f32 %v1633_v16, %v598_v17 }
 0x1aa   : > { %v606_v20 = vadd.f32 %v605_v19, %v574_v18  ;;  %v674_v24 = vpack.c.bf16 %v605_v19, %v605_v19 }
 0x1ac   : > { %v607_v22 = vpack.c.bf16 %v606_v20, %v606_v20 }
 0x1ae   : > { %1715 = vmatmul.mubr.msk.bf16.vlgmr.msra.gmra.mrb[0].mxu1 %vm577_vm0, %v607_v22 }
 0x1af   : > { %1719 = vmatpush3.bf16.msra.mxu1 %v1891_v21  ;;  %1722 = vmatprep.mubr.msk.bf16.mxu1 %vm2087_vm1, %v2086_v8 }
 0x1b0   : > { %1720 = vmatprep.subr.bf16.mxu1 %v2086_v8 }
 0x1b3   : > { %1721 = vmatpush3.bf16.msra.mxu1 %v1892_v23 }
 0x1b4   : > { %1726 = vmatprep.subr.bf16.mxu1 %v2086_v8 }
 0x1b6   : > { %1723 = vmatmul.mubr.msk.bf16.vlgmr.msra.gmra.mrb[4].mxu1 %vm577_vm0, %v674_v24 }
 0x1b7   : > { %1728 = vmatprep.mubr.msk.bf16.mxu1 %vm2087_vm1, %v2086_v8 }
 0x281   : > { %v668_v26 = vpop.f32.mrb[0].mxu1 }
 0x282   : > { %v669_v27 = vadd.f32 %v1634_v25, %v668_v26  ;;  %v1716_v28 = vpop.f32.mrb[1].mxu1 }
 0x283   : > { %v671_v29 = vpop.f32.mrb[2].mxu1 }
 0x284   : > { %748 = vrot.lane.b32.xlu0 %v669_v27, %s2088_s23  ;;  %742 = vrot.lane.b32.xlu1 %v669_v27, %s2089_s30  ;;  %v1717_v30 = vpop.f32.mrb[3].mxu1  ;;  %v751_v33 = vpack.c.bf16 %v669_v27, %v669_v27 }
 0x288   : > { %745 = vrot.lane.b32.xlu1 %v669_v27, %s2090_s27 }
 0x289   : > { %v735_v31 = vpop.f32.mrb[4].mxu1 }
 0x28a   : > { %v1724_v32 = vpop.f32.mrb[5].mxu1  ;;  %v2393_v48 = vadd.f32 %v1638_v46, %v735_v31 }
 0x28b   : > { %v738_v34 = vpop.f32.mrb[6].mxu1 }
 0x28c   : > { %770 = vrot.lane.b32.xlu1 %v751_v33, %s2091_s21  ;;  %v1725_v35 = vpop.f32.mrb[7].mxu1  ;;  %v765_v52 = vpack.c.bf16 %v2393_v48, %v2393_v48 }
 0x28e   : > { %v1019_v53 = vsel %vm1017_vm3, %v765_v52, 0 }
 0x2f6   : > { %v743_v36 = vpop.permute.xlu1 %742  ;;  %v749_v40 = vpop.permute.xlu0 %748 }
 0x2f7   : > { %v752_v37 = vpack.c.bf16 %v743_v36, %v743_v36  ;;  %v754_v42 = vpack.c.bf16 %v749_v40, %v749_v40 }
 0x2f9   : > { %820 = vrot.lane.b32.xlu1 %v752_v37, %s2091_s21 }
 0x2fa   : > { %v746_v38 = vpop.permute.xlu1 %745 }
 0x2fb   : > { %v753_v39 = vpack.c.bf16 %v746_v38, %v746_v38 }
 0x2fd   : > { %869 = vrot.lane.b32.xlu1 %v753_v39, %s2091_s21 }
 0x2fe   : > { %v771_v41 = vpop.permute.xlu1 %770 }
 0x2ff   : > { %v777_v43 = vsel %vm772_vm2, %v771_v41, 0 }
 0x300   : > { %1727 = vmatpush3.bf16.xpose.msra.mxu1 %v777_v43 }
 0x301   : > { %918 = vrot.lane.b32.xlu1 %v754_v42, %s2091_s21  ;;  %1732 = vmatprep.subr.bf16.mxu1 %v2086_v8  ;;  %s2615_s21 = sld [smem:[#allocation21_spill]] }
 0x307   : > { %1729 = vmatmul.mubr.msk.bf16.vlgmr.msra.gmra.mrb[8].mxu1 %vm772_vm2, %v751_v33  ;;  %s2616_s20 = smov %s2615_s21  ;;  %s2520_s28 = scalar_lea.hbm %s2615_s21, %s1670_s29 }
 0x308   : > { %1734 = vmatprep.mubr.msk.bf16.mxu1 %vm2087_vm1, %v2086_v8 }
 0x36b   : > { %v821_v44 = vpop.permute.xlu1 %820 }
 0x36c   : > { %v826_v45 = vsel %vm772_vm2, %v821_v44, 0 }
 0x36d   : > { %1733 = vmatpush3.bf16.xpose.msra.mxu1 %v826_v45 }
 0x36e   : > { %1744 = vmatprep.subr.bf16.mxu1 %v2086_v8 }
 0x36f   : > { %v870_v47 = vpop.permute.xlu1 %869 }
 0x370   : > { %v875_v49 = vsel %vm772_vm2, %v870_v47, 0 }
 0x371   : > { %1739 = vmatpush3.bf16.xpose.msra.mxu0 %v875_v49 }
 0x372   : > { %1750 = vmatprep.subr.bf16.mxu0 %v2086_v8 }
 0x373   : > { %v919_v50 = vpop.permute.xlu1 %918 }
 0x374   : > { %v924_v51 = vsel %vm772_vm2, %v919_v50, 0  ;;  %1735 = vmatmul.mubr.msk.bf16.vlgmr.msra.gmra.mrb[12].mxu1 %vm772_vm2, %v752_v37 }
 0x375   : > { %1745 = vmatpush3.bf16.xpose.msra.mxu1 %v924_v51  ;;  %1746 = vmatprep.mubr.msk.bf16.mxu1 %vm2087_vm1, %v2086_v8 }
 0x376   : > { %1756 = vmatprep.subr.bf16.mxu1 %v2086_v8 }
 0x378   : > { %1741 = vmatmul.mubr.msk.bf16.vlgmr.msra.gmra.mrb[0].mxu0 %vm772_vm2, %v753_v39 }
 0x379   : > { %1751 = vmatpush3.bf16.msra.mxu0 %v1019_v53  ;;  %1752 = vmatprep.mubr.msk.bf16.mxu0 %vm2087_vm1, %v2086_v8 }
 0x37a   : > { %1762 = vmatprep.subr.bf16.mxu0 %v2086_v8 }
 0x37c   : > { %1747 = vmatmul.mubr.msk.bf16.vlgmr.msra.gmra.mrb[16].mxu1 %vm772_vm2, %v754_v42 }
 0x37d   : > { %1758 = vmatprep.mubr.msk.bf16.mxu1 %vm2087_vm1, %v2086_v8 }
 0x3da   : > { %v813_v54 = vpop.f32.mrb[8].mxu1 }
 0x3db   : > { %v1730_v55 = vpop.f32.mrb[9].mxu1  ;;  %v966_v56 = vsel %vm772_vm2, %v813_v54, -inf }
 0x3dc   : > { %967 = vmax.xlane.f32.xlu1 %v966_v56  ;;  %v816_v57 = vpop.f32.mrb[10].mxu1 }
 0x3dd   : > { %v1731_v58 = vpop.f32.mrb[11].mxu1 }
 0x447   : > { %v862_v59 = vpop.f32.mrb[12].mxu1 }
 0x448   : > { %v1736_v60 = vpop.f32.mrb[13].mxu1  ;;  %v969_v61 = vsel %vm772_vm2, %v862_v59, -inf }
 0x449   : > { %970 = vmax.xlane.f32.xlu0 %v969_v61  ;;  %v865_v62 = vpop.f32.mrb[14].mxu1  ;;  %v1893_v61 = vld [vmem:[%s2571_s8] sm:$0xff]  }
 0x44a   : > { %v1737_v63 = vpop.f32.mrb[15].mxu1  ;;  %v1894_v62 = vld [vmem:[%s2571_s8 + $0x8] sm:$0xff]  }
 0x44b   : > { %v911_v1 = vpop.f32.mrb[0].mxu0 }
 0x44c   : > { %v1742_v2 = vpop.f32.mrb[1].mxu0  ;;  %v972_v3 = vsel %vm772_vm2, %v911_v1, -inf }
 0x44d   : > { %v914_v4 = vpop.f32.mrb[2].mxu0  ;;  %973 = vmax.xlane.f32.xlu1 %v972_v3 }
 0x44e   : > { %v1743_v5 = vpop.f32.mrb[3].mxu0 }
 0x44f   : > { %v960_v6 = vpop.f32.mrb[16].mxu1 }
 0x450   : > { %v1748_v7 = vpop.f32.mrb[17].mxu1  ;;  %v975_v9 = vsel %vm772_vm2, %v960_v6, -inf }
 0x451   : > { %976 = vmax.xlane.f32.xlu0 %v975_v9  ;;  %v963_v10 = vpop.f32.mrb[18].mxu1 }
 0x452   : > { %v1749_v11 = vpop.f32.mrb[19].mxu1 }
 0x45e   : > { %756 = vrot.lane.b32.xlu1 %v2393_v48, %s2089_s30 }
 0x469   : > { %v968_v12 = vpop.xlane.xlu1 %967 }
 0x46a   : > { %v978_v13 = vsub.f32 %v813_v54, %v968_v12 }
 0x46c   : > { %v982_v14 = vmul.f32 1.442695, %v978_v13 }
 0x46e   : > { %1907 = vpow2.f32 %v982_v14 }
 0x478   : > { %v1908_v15 = vpop.eup %1907 }
 0x479   : > { %v990_v16 = vsel %vm772_vm2, %v1908_v15, 0.0 }
 0x482   : > { %991 = vadd.xlane.f32.xlu1 %v990_v16 }
 0x4d6   : > { %v971_v17 = vpop.xlane.xlu0 %970 }
 0x4d7   : > { %v979_v18 = vsub.f32 %v862_v59, %v971_v17 }
 0x4d9   : > { %v984_v19 = vmul.f32 1.442695, %v979_v18 }
 0x4da   : > { %v974_v20 = vpop.xlane.xlu1 %973 }
 0x4db   : > { %1909 = vpow2.f32 %v984_v19  ;;  %v980_v21 = vsub.f32 %v911_v1, %v974_v20  ;;  %v1650_v20 = vld [vmem:[#allocation7] ss:$0 sm:$0xff] }
 0x4dd   : > { %v986_v22 = vmul.f32 1.442695, %v980_v21 }
 0x4de   : > { %v757_v23 = vpop.permute.xlu1 %756  ;;  %v977_v24 = vpop.xlane.xlu0 %976 }
 0x4df   : > { %1911 = vpow2.f32 %v986_v22  ;;  %v766_v25 = vpack.c.bf16 %v757_v23, %v757_v23  ;;  %v981_v26 = vsub.f32 %v960_v6, %v977_v24 }
 0x4e1   : > { %v1065_v27 = vsel %vm1017_vm3, %v766_v25, 0  ;;  %v988_v28 = vmul.f32 1.442695, %v981_v26 }
 0x4e2   : > { %1757 = vmatpush3.bf16.msra.mxu1 %v1065_v27 }
 0x4e3   : > { %1913 = vpow2.f32 %v988_v28  ;;  %1768 = vmatprep.subr.bf16.mxu1 %v2086_v8 }
 0x4e5   : > { %v1910_v29 = vpop.eup %1909 }
 0x4e6   : > { %v993_v30 = vsel %vm772_vm2, %v1910_v29, 0.0 }
 0x4e7   : > { %994 = vadd.xlane.f32.xlu0 %v993_v30 }
 0x4e9   : > { %v1912_v31 = vpop.eup %1911 }
 0x4ea   : > { %v996_v32 = vsel %vm772_vm2, %v1912_v31, 0.0 }
 0x4eb   : > { %997 = vadd.xlane.f32.xlu1 %v996_v32 }
 0x4ed   : > { %v1914_v33 = vpop.eup %1913 }
 0x4ee   : > { %v999_v34 = vsel %vm772_vm2, %v1914_v33, 0.0 }
 0x4ef   : > { %1000 = vadd.xlane.f32.xlu0 %v999_v34 }
 0x4fc   : > { %762 = vrot.lane.b32.xlu1 %v2393_v48, %s2088_s23 }
 0x505   : > { %759 = vrot.lane.b32.xlu0 %v2393_v48, %s2090_s27 }
 0x50f   : > { %v992_v35 = vpop.xlane.xlu1 %991 }
 0x510   : > { %1915 = vrcp.f32 %v992_v35 }
 0x51a   : > { %v1916_v36 = vpop.eup %1915 }
 0x51b   : > { %v1006_v37 = vmul.f32 %v1916_v36, %v1908_v15 }
 0x51d   : > { %v1010_v38 = vpack.c.bf16 %v1006_v37, %v1006_v37 }
 0x51f   : > { %1753 = vmatmul.mubr.msk.bf16.vlgmr.msra.gmra.mrb[4].mxu0 %vm772_vm2, %v1010_v38  ;;  %v1654_v38 = vld [vmem:[%s2573_s10] ss:$0 sm:$0xff] }
 0x520   : > { %1764 = vmatprep.mubr.msk.bf16.mxu0 %vm2087_vm1, %v2086_v8 }
 0x574   : > { %v995_v39 = vpop.xlane.xlu0 %994 }
 0x575   : > { %1917 = vrcp.f32 %v995_v39 }
 0x578   : > { %v998_v40 = vpop.xlane.xlu1 %997 }
 0x579   : > { %1919 = vrcp.f32 %v998_v40  ;;  %v1655_v40 = vld [vmem:[%s2574_s11] ss:$0 sm:$0xff] }
 0x57c   : > { %v1001_v41 = vpop.xlane.xlu0 %1000  ;;  %v763_v42 = vpop.permute.xlu1 %762 }
 0x57d   : > { %1921 = vrcp.f32 %v1001_v41  ;;  %v768_v45 = vpack.c.bf16 %v763_v42, %v763_v42 }
 0x57f   : > { %v1918_v43 = vpop.eup %1917  ;;  %v1157_v52 = vsel %vm1017_vm3, %v768_v45, 0  ;;  %v1898_v45 = vld [vmem:[%s2577_s14 + $0x8] sm:$0xff]  }
 0x580   : > { %v1007_v44 = vmul.f32 %v1918_v43, %v1910_v29  ;;  %v760_v46 = vpop.permute.xlu0 %759 }
 0x581   : > { %v767_v47 = vpack.c.bf16 %v760_v46, %v760_v46  ;;  %v1899_v46 = vld [vmem:[%s2577_s14 + $0x10] sm:$0xff]  }
 0x582   : > { %v1011_v48 = vpack.c.bf16 %v1007_v44, %v1007_v44  ;;  %v1897_v44 = vld [vmem:[%s2577_s14] sm:$0xff]  }
 0x583   : > { %v1920_v49 = vpop.eup %1919  ;;  %v1111_v50 = vsel %vm1017_vm3, %v767_v47, 0  ;;  %v1900_v47 = vld [vmem:[%s2577_s14 + $0x18] sm:$0xff]  }
 0x584   : > { %v1008_v51 = vmul.f32 %v1920_v49, %v1912_v31  ;;  %1759 = vmatmul.mubr.msk.bf16.vlgmr.msra.gmra.mrb[20].mxu1 %vm772_vm2, %v1011_v48  ;;  %1763 = vmatpush3.bf16.msra.mxu0 %v1111_v50  ;;  %v1901_v48 = vld [vmem:[%s2577_s14 + $0x20] sm:$0xff]   ;;  %v1902_v49 = vld [vmem:[%s2577_s14 + $0x28] sm:$0xff]   ;;  %v1903_v50 = vld [vmem:[%s2577_s14 + $0x30] sm:$0xff]  }
 0x585   : > { %1769 = vmatpush3.bf16.msra.mxu1 %v1157_v52  ;;  %1770 = vmatprep.mubr.msk.bf16.mxu1 %vm2087_vm1, %v2086_v8  ;;  %v1656_v52 = vld [vmem:[%s2576_s13] ss:$0 sm:$0xff] }
 0x586   : > { %v1012_v53 = vpack.c.bf16 %v1008_v51, %v1008_v51  ;;  %1774 = vmatprep.subr.bf16.mxu0 %v2086_v8  ;;  %1782 = vmatprep.subr.bf16.mxu1 %v2086_v8  ;;  %v1904_v51 = vld [vmem:[%s2577_s14 + $0x38] sm:$0xff]  }
 0x587   : > { %v1922_v54 = vpop.eup %1921 }
 0x588   : > { %v1009_v55 = vmul.f32 %v1922_v54, %v1914_v33  ;;  %1765 = vmatmul.mubr.msk.bf16.vlgmr.msra.gmra.mrb[8].mxu0 %vm772_vm2, %v1012_v53  ;;  %v1895_v33 = vld [vmem:[%s2575_s12] sm:$0xff]  }
 0x589   : > { %1778 = vmatprep.mubr.msk.bf16.mxu0 %vm2087_vm1, %v2086_v8  ;;  %1775 = vmatpush3.bf16.msra.mxu0 %v1893_v61 }
 0x58a   : > { %v1013_v56 = vpack.c.bf16 %v1009_v55, %v1009_v55  ;;  %1776 = vmatprep.subr.bf16.mxu0 %v2086_v8 }
 0x58c   : > { %1771 = vmatmul.mubr.msk.bf16.vlgmr.msra.gmra.mrb[24].mxu1 %vm772_vm2, %v1013_v56 }
 0x58d   : > { %1786 = vmatprep.mubr.msk.bf16.mxu1 %vm2087_vm1, %v2086_v8  ;;  %1777 = vmatpush3.bf16.msra.mxu0 %v1894_v62 }
 0x58e   : > { %1790 = vmatprep.subr.bf16.mxu0 %v2086_v8  ;;  %1783 = vmatpush3.bf16.msra.mxu1 %v1895_v33 }
 0x58f   : > { %1784 = vmatprep.subr.bf16.mxu1 %v2086_v8 }
 0x5f2   : > { %v1055_v57 = vpop.f32.mrb[4].mxu0 }
 0x5f3   : > { %v1754_v58 = vpop.f32.mrb[5].mxu0 }
 0x5f4   : > { %v1058_v59 = vpop.f32.mrb[6].mxu0 }
 0x5f5   : > { %v1755_v60 = vpop.f32.mrb[7].mxu0 }
 0x657   : > { %v1101_v63 = vpop.f32.mrb[20].mxu1 }
 0x658   : > { %1200 = vrot.lane.b32.xlu1 %v1101_v63, %s2092_s24  ;;  %v1760_v1 = vpop.f32.mrb[21].mxu1  ;;  %s1629_s24 = sshll.u32 %s561_s0, 3 }
 0x659   : > { %v1104_v2 = vpop.f32.mrb[22].mxu1  ;;  %s563_s19 = scalar_lea.vmem [#allocation8], %s1629_s24  ;;  %s2095_s24 = smov [#allocation8]  }
 0x65a   : > { %v1761_v3 = vpop.f32.mrb[23].mxu1  ;;  %s1517_s23 = sshll.u32 %s563_s19, 4  ;;  %s2522_s23 = int_to_ptr.vmem [resolvable:$true] %s1517_s23 }
 0x65b   : > { %v1147_v4 = vpop.f32.mrb[8].mxu0  ;;  %s2011_s15 = scalar_lea.vmem %s2522_s23, 128 }
 0x65c   : > { %1204 = vrot.lane.b32.xlu0 %v1147_v4, %s2093_s18  ;;  %v1766_v5 = vpop.f32.mrb[9].mxu0  ;;  %v1660_v4 = vld [vmem:[%s2613_s17] ss:$0 sm:$0xff]  ;;  %p2012_p12 = scmp.ne.s32.totalorder %s2522_s23, %s2011_s15  ;;  %s2015_s18 = sshll.u32 %s2095_s24, 4  ;;  %s2016_s18 = int_to_ptr.vmem [resolvable:$false] %s2015_s18 }
 0x65d   : > { %v1150_v6 = vpop.f32.mrb[10].mxu0  ;;  %p2018_p4 = scmp.lt.s32.totalorder %s2522_s23, %s2016_s18 }
 0x65e   : > { %v1767_v7 = vpop.f32.mrb[11].mxu0  ;;  %p2013_p2 = pnand %p2012_p12, %p2617_p10 }
 0x65f   : > { %v1193_v9 = vpop.f32.mrb[24].mxu1 }
 0x660   : > { %1208 = vrot.lane.b32.xlu1 %v1193_v9, %s2094_s26  ;;  %v1772_v10 = vpop.f32.mrb[25].mxu1  ;;  %p2014_p3 = pneg %p2013_p2  ;;  %s2017_s26 = scalar_lea.vmem %s2016_s18, 256 }
 0x661   : > { %v1196_v11 = vpop.f32.mrb[26].mxu1  ;;  %p2019_p7 = scmp.lt.s32.totalorder %s2017_s26, %s2011_s15 }
 0x662   : > { %v1773_v12 = vpop.f32.mrb[27].mxu1 }
 0x663   : > { %p2020_p8 = por %p2019_p7, %p2018_p4 }
 0x665   : > { %p2021_p11 = pnand %p2020_p8, %p2014_p3 }
 0x6ca   : > { %v1201_v13 = vpop.permute.xlu1 %1200 }
 0x6cb   : > { %v1211_v15 = vsel %vm772_vm2, %v1055_v57, %v1201_v13 }
 0x6ce   : > { %v1205_v14 = vpop.permute.xlu0 %1204 }
 0x6cf   : > { %v1213_v16 = vsel %vm1212_vm4, %v1211_v15, %v1205_v14 }
 0x6d2   : > { %v1209_v17 = vpop.permute.xlu1 %1208 }
 0x6d3   : > { %v1215_v18 = vsel %vm1214_vm5, %v1213_v16, %v1209_v17 }
 0x6d4   : > { %v1216_v19 = vpack.c.bf16 %v1215_v18, %v1215_v18 }
 0x6d6   : > { %1779 = vmatmul.mubr.msk.bf16.vlgmr.msra.gmra.mrb[12].mxu0 %vm577_vm0, %v1216_v19 }
 0x6d7   : > { %1806 = vmatprep.mubr.msk.bf16.mxu0 %vm2087_vm1, %v2086_v8  ;;  %1791 = vmatpush3.bf16.msra.mxu0 %v1897_v44 }
 0x6d8   : > { %1792 = vmatprep.subr.bf16.mxu0 %v2086_v8 }
 0x6db   : > { %1793 = vmatpush3.bf16.msra.mxu0 %v1898_v45 }
 0x6dc   : > { %1794 = vmatprep.subr.bf16.mxu0 %v2086_v8 }
 0x6df   : > { %1795 = vmatpush3.bf16.msra.mxu0 %v1899_v46 }
 0x6e0   : > { %1796 = vmatprep.subr.bf16.mxu0 %v2086_v8 }
 0x6e3   : > { %1797 = vmatpush3.bf16.msra.mxu0 %v1900_v47 }
 0x6e4   : > { %1798 = vmatprep.subr.bf16.mxu0 %v2086_v8 }
 0x6e7   : > { %1799 = vmatpush3.bf16.msra.mxu0 %v1901_v48 }
 0x6e8   : > { %1800 = vmatprep.subr.bf16.mxu0 %v2086_v8 }
 0x6eb   : > { %1801 = vmatpush3.bf16.msra.mxu0 %v1902_v49 }
 0x6ec   : > { %1802 = vmatprep.subr.bf16.mxu0 %v2086_v8 }
 0x6ef   : > { %1803 = vmatpush3.bf16.msra.mxu0 %v1903_v50 }
 0x6f0   : > { %1804 = vmatprep.subr.bf16.mxu0 %v2086_v8 }
 0x6f3   : > { %1805 = vmatpush3.bf16.msra.mxu0 %v1904_v51 }
 0x7a9   : > { %v1277_v21 = vpop.f32.mrb[12].mxu0 }
 0x7aa   : > { %v1278_v22 = vadd.f32 %v1650_v20, %v1277_v21  ;;  %v1780_v23 = vpop.f32.mrb[13].mxu0 }
 0x7ab   : > { %v1280_v24 = vpop.f32.mrb[14].mxu0 }
 0x7ac   : > { %v2457_v25 = vadd.f32 %v1278_v22, %v2338_v0  ;;  %v1781_v26 = vpop.f32.mrb[15].mxu0  ;;  %v1896_v0 = vld [vmem:[%s2575_s12 + $0x8] sm:$0xff]  }
 0x7ad   : > { %1785 = vmatpush3.bf16.msra.mxu1 %v1896_v0 }
 0x7ae   : > { %v1286_v27 = vsel %vm577_vm0, %v2457_v25, 0.0 }
 0x7af   : > { %1287 = vadd.xlane.f32.xlu0 %v1286_v27 }
 0x83c   : > { %v1288_v28 = vpop.xlane.xlu0 %1287 }
 0x83d   : > { %v1289_v29 = vmul.f32 0.03125, %v1288_v28 }
 0x83f   : > { %v1290_v30 = vsub.f32 %v2457_v25, %v1289_v29 }
 0x841   : > { %v1291_v31 = vmul.f32 %v1290_v30, %v1290_v30 }
 0x843   : > { %v1292_v32 = vsel %vm577_vm0, %v1291_v31, 0.0 }
 0x844   : > { %1293 = vadd.xlane.f32.xlu1 %v1292_v32 }
 0x8d1   : > { %v1294_v34 = vpop.xlane.xlu1 %1293 }
 0x8d2   : > { %v1295_v35 = vmul.f32 0.03125, %v1294_v34 }
 0x8d4   : > { %v1296_v36 = vadd.f32 1e-05, %v1295_v35 }
 0x8d6   : > { %1923 = vrsqrt.f32 %v1296_v36 }
 0x8e0   : > { %v1924_v37 = vpop.eup %1923 }
 0x8e1   : > { %v1298_v39 = vmul.f32 %v1924_v37, %v1290_v30 }
 0x8e3   : > { %v1305_v41 = vmul.f32 %v1654_v38, %v1298_v39 }
 0x8e5   : > { %v1312_v42 = vadd.f32 %v1655_v40, %v1305_v41 }
 0x8e7   : > { %v1313_v43 = vpack.c.bf16 %v1312_v42, %v1312_v42 }
 0x8e9   : > { %1787 = vmatmul.mubr.msk.bf16.vlgmr.msra.gmra.mrb[28].mxu1 %vm577_vm0, %v1313_v43 }
 0x9bc   : > { %v1374_v53 = vpop.f32.mrb[28].mxu1 }
 0x9bd   : > { %v1375_v54 = vadd.f32 %v1656_v52, %v1374_v53  ;;  %v1788_v55 = vpop.f32.mrb[29].mxu1 }
 0x9be   : > { %v1377_v56 = vpop.f32.mrb[30].mxu1 }
 0x9bf   : > { %v1380_v57 = vmul.f32 %v1375_v54, %v1375_v54  ;;  %v1789_v58 = vpop.f32.mrb[31].mxu1 }
 0x9c1   : > { %v1381_v59 = vmul.f32 %v1380_v57, %v1375_v54 }
 0x9c3   : > { %v1382_v60 = vmul.f32 0.044715, %v1381_v59 }
 0x9c5   : > { %v1383_v61 = vadd.f32 %v1382_v60, %v1375_v54 }
 0x9c7   : > { %v1384_v62 = vmul.f32 0.7978846, %v1383_v61 }
 0x9c9   : > { %1925 = vtanh.f32 %v1384_v62 }
 0x9d3   : > { %v1926_v63 = vpop.eup %1925 }
 0x9d4   : > { %v1386_v8 = vadd.f32 1.0, %v1926_v63 }
 0x9d6   : > { %v1387_v1 = vmul.f32 0.5, %v1386_v8 }
 0x9d8   : > { %v1388_v2 = vmul.f32 %v1387_v1, %v1375_v54 }
 0x9da   : > { %v1389_v3 = vpack.c.bf16 %v1388_v2, %v1388_v2 }
 0x9dc   : > { %1807 = vmatmul.mubr.bf16.vlgmr.msra.gmra.mrb[16].mxu0 %v1389_v3 }
 0xaaf   : > { %v1495_v5 = vpop.f32.mrb[16].mxu0 }
 0xab0   : > { %v1496_v6 = vadd.f32 %v1660_v4, %v1495_v5  ;;  %v1808_v7 = vpop.f32.mrb[17].mxu0 }
 0xab1   : > { %v1498_v9 = vpop.f32.mrb[18].mxu0 }
 0xab2   : > { %v1501_v10 = vadd.f32 %v1496_v6, %v2457_v25  ;;  %v1809_v11 = vpop.f32.mrb[19].mxu0 }
 0xab4   : > { %1502 = vst.msk [vmem:[%s563_s19] sm:$0xff] %vm577_vm0, %v1501_v10 }
 0xab5   : > { %2024 = shalt.err (!%p2021_p11)
}
 0xab6   : > { %s2025_s0 = scalar_lea.hbm %s2520_s28, 128  ;;  %s2029_s19 = scalar_lea.hbm %s2616_s20, 256 }
 0xab7   : > { %p2026_p13 = scmp.ne.s32.totalorder %s2520_s28, %s2025_s0  ;;  %p2030_p6 = scmp.lt.u32.totalorder %s2520_s28, %s2616_s20 }
 0xab8   : > { %p2031_p5 = scmp.lt.u32.totalorder %s2029_s19, %s2025_s0  ;;  %p2033_p12 = scmp.lt.u32.totalorder %s2025_s0, %s2520_s28 }
 0xab9   : > { %p2027_p0 = pnand %p2026_p13, %p2617_p10 }
 0xaba   : > { %p2032_p9 = por %p2031_p5, %p2030_p6 }
 0xabb   : > { %p2028_p1 = pneg %p2027_p0 }
 0xabc   : > { %p2034_p2 = por %p2033_p12, %p2032_p9 }
 0xabe   : > { %p2035_p3 = pnand %p2034_p2, %p2028_p1 }
 0xac0   : > { %2038 = shalt.err (!%p2035_p3)
}
 0xac1   : > { %1822 = dma.vmem_to_hbm [thread:$0]  (%p2617_p10), %s2522_s23, 128, %s2520_s28, %s1504_s25  }
 0xac2 PF: > { %s2618_s21 = sld [smem:[#allocation14_spill]]  ;;  %s2619_s15 = sld [smem:[#allocation12_spill]] }
 0xac3   : > { %s2620_s24 = sld [smem:[#allocation18_spill]] }
 0xac8   : > { %p1844_p4 = scmp.ge.s32.totalorder %s2618_s21, 2  ;;  %s1529_s18 = sand.u32 1, %s2619_s15  }
 0xac9   : > { %p2621_p7 = scmp.ne.s32.totalorder %s2620_s24, 0  ;;  %s1530_s26 = scalar_lea.sflag [#allocation4], %s1529_s18 }
 0xacb   : > { %p1835_p8 = pnand %p1844_p4, %p2621_p7 }
 0xacd   : > { %2064 = dma.done.wait (!%p1835_p8), %s1530_s26, 128  }
 0xace   : > { %2066 = vsyncadd (!%p1835_p8), %s1530_s26, 4294967168  ;;  %s2622_s24 = sld [smem:[#allocation15_spill]]  ;;  %s2623_s0 = sld [smem:[#allocation13_spill]] }
 0xacf   : > { %s2624_s23 = sld [smem:[#allocation16_spill]]  ;;  %s2625_s21 = smov %s2073_s22 }
 0xad4   : > { %p28_p11 = scmp.ge.s32.totalorder %s2622_s24, 4   ;;  %s2626_s22 = smov %s2623_s0 }
 0xad6   :  { %30 = sbr.rel (!%p28_p11) target bundleno = 9 (0x9), region = 135 }
 0xadd   :  { %1535 = vsyncpa [#allocation3], 1 }
 0xade   :  { %1537 = vsyncpa [#allocation3 + $0x1], 1 }
 0xadf   :  { %1538 = vsyncpa [#allocation6], 1 }
 0xae0   :  { %1539 = vsyncpa [#allocation4], 1 }
 0xae1   :  { %1541 = vsyncpa [#allocation4 + $0x1], 1 }

</bundles_post_ra>
